<compile_context>
chip_gen: v5e
topology: v5e:2x2
jax: 0.10.0
libtpu: 0.0.40
codegen_flags: <defaults>
</compile_context>

<pallas_src>
import jax
import jax.numpy as jnp
import numpy as np
from jax.experimental import pallas as pl
from jax.experimental.pallas import tpu as pltpu


def ae_kernel(x_ref, we_ref, be_ref, wd_ref, bd_ref, o_ref):
    """out = sigmoid( sigmoid(x @ W_enc + b_enc) @ W_dec + b_dec )."""
    x = x_ref[...]  # MXU consumes the input dtype directly; f32 accumulation below
    feat = jax.nn.sigmoid(
        jnp.dot(x, we_ref[...], preferred_element_type=jnp.float32) + be_ref[...])
    out = jax.nn.sigmoid(
        jnp.dot(feat, wd_ref[...], preferred_element_type=jnp.float32) + bd_ref[...])
    o_ref[...] = out.astype(o_ref.dtype)


def _pack_factor(B, input_size, latent_size, output_size):
    """Pack p consecutive batch rows per kernel row for lane density (exact)."""
    if max(input_size, output_size) >= 128:
        return 1
    for p in (4, 2):
        if B % p == 0 and p * max(input_size, latent_size, output_size) <= 256:
            return p
    return 1


def _pick_row_tile(R):
    """Rows per grid step of the (rows, lanes) kernel view.

    Grid steps are a sequential loop on one TensorCore (~0.35 us each), so on
    single-TC parts (v5e/v6e) we want a single step whenever the tile is
    comfortably within VMEM. For large R we use a small EVEN step count so
    v7x megacore splits the 'parallel' axis evenly across both TCs and the
    auto double-buffer overlaps the next tile's DMA with compute.
    """
    if R <= 2048:
        return R                                    # one grid step
    for steps in (2, 4, 8, 16, 32, 64):
        t = R // steps
        if R % steps == 0 and t % 8 == 0 and t <= 16384:
            return t
    # fallback: largest divisor of R that keeps blocks (8,128)-legal
    for t in range(min(R // 2, 16384), 7, -1):
        if R % t == 0 and t % 8 == 0:
            return t
    return R


def ae_forward(x, params, *, row_tile=None):
    """x: (B, input_size). params: dict of (in,out) weights / (1,out) biases."""
    B, input_size = x.shape
    w1, b1 = params["w1"], params["b1"]
    w2, b2 = params["w2"], params["b2"]
    w3, b3 = params["w3"], params["b3"]
    w4, b4 = params["w4"], params["b4"]
    latent_size = w2.shape[1]
    output_size = w4.shape[1]

    # --- algebraic fusion of the two activation-free linears (f32, once) ---
    w_enc = jnp.dot(w1, w2, preferred_element_type=jnp.float32)        # (in, latent)
    b_enc = jnp.dot(b1, w2, preferred_element_type=jnp.float32) + b2   # (1, latent)
    w_dec = jnp.dot(w3, w4, preferred_element_type=jnp.float32)        # (latent, out)
    b_dec = jnp.dot(b3, w4, preferred_element_type=jnp.float32) + b4   # (1, out)

    # --- exact lane packing: p batch rows per kernel row (block-diag weights) ---
    p = _pack_factor(B, input_size, latent_size, output_size)
    if p > 1:
        eye = jnp.eye(p, dtype=w_enc.dtype)
        w_enc = jnp.kron(eye, w_enc)            # (p*in, p*latent), block diagonal
        b_enc = jnp.tile(b_enc, (1, p))         # (1, p*latent)
        w_dec = jnp.kron(eye, w_dec)            # (p*latent, p*out), block diagonal
        b_dec = jnp.tile(b_dec, (1, p))         # (1, p*out)
        xk = x.reshape(B // p, p * input_size)  # free, contiguous row packing
    else:
        xk = x

    rows, in_lanes = xk.shape
    mid_lanes = p * latent_size
    out_lanes = p * output_size

    if row_tile is None:
        row_tile = _pick_row_tile(rows)
    assert rows % row_tile == 0, "row_tile must divide the (packed) row count"

    def resident(shape):
        # Whole small fused parameter in VMEM; constant index_map -> fetched
        # once and kept resident across all grid steps.
        return pl.BlockSpec(shape, lambda i: (0, 0))

    out_packed = pl.pallas_call(
        ae_kernel,
        out_shape=jax.ShapeDtypeStruct((rows, out_lanes), x.dtype),
        grid_spec=pltpu.PrefetchScalarGridSpec(
            num_scalar_prefetch=0,
            grid=(rows // row_tile,),
            in_specs=[
                pl.BlockSpec((row_tile, in_lanes), lambda i: (i, 0)),  # x tile
                resident((in_lanes, mid_lanes)),    # W_enc (block-diag if packed)
                resident((1, mid_lanes)),           # b_enc
                resident((mid_lanes, out_lanes)),   # W_dec (block-diag if packed)
                resident((1, out_lanes)),           # b_dec
            ],
            out_specs=pl.BlockSpec((row_tile, out_lanes), lambda i: (i, 0)),
        ),
        compiler_params=pltpu.CompilerParams(
            dimension_semantics=("parallel",)),
    )(xk, w_enc, b_enc, w_dec, b_dec)

    return out_packed.reshape(B, output_size) if p > 1 else out_packed


def init_params(key, input_size, output_size, latent_size, hidden_size):
    """Deterministic synthetic init. Weights stored as (in, out) for x @ W."""
    ks = jax.random.split(key, 8)

    def lin(kw, kb, fan_in, fan_out):
        # torch.nn.Linear-style uniform(-1/sqrt(fan_in), 1/sqrt(fan_in))
        bound = 1.0 / np.sqrt(fan_in)
        w = jax.random.uniform(kw, (fan_in, fan_out), jnp.float32, -bound, bound)
        b = jax.random.uniform(kb, (1, fan_out), jnp.float32, -bound, bound)
        return w, b

    w1, b1 = lin(ks[0], ks[1], input_size, hidden_size)    # encoder.linear1
    w2, b2 = lin(ks[2], ks[3], hidden_size, latent_size)   # encoder.linear2
    w3, b3 = lin(ks[4], ks[5], latent_size, hidden_size)   # decoder.linear1
    w4, b4 = lin(ks[6], ks[7], hidden_size, output_size)   # decoder.linear2
    return dict(w1=w1, b1=b1, w2=w2, b2=b2, w3=w3, b3=b3, w4=w4, b4=b4)


def ae_reference(x, p):
    """Layer-by-layer reference matching the PyTorch module exactly."""
    h1 = x @ p["w1"] + p["b1"]
    feat = jax.nn.sigmoid(h1 @ p["w2"] + p["b2"])
    h2 = feat @ p["w3"] + p["b3"]
    return jax.nn.sigmoid(h2 @ p["w4"] + p["b4"])


if __name__ == "__main__":
    input_size, output_size, latent_size, hidden_size = 32, 32, 16, 32
    batch = 16

    key = jax.random.PRNGKey(0)
    kx, kp = jax.random.split(key)
    x = jax.random.normal(kx, (batch, input_size), jnp.float32)
    params = init_params(kp, input_size, output_size, latent_size, hidden_size)

    # Demo batch is small -> p=4 lane packing, single grid step.
    out = jax.block_until_ready(ae_forward(x, params))
    ref = jax.block_until_ready(ae_reference(x, params))
    np.testing.assert_allclose(np.asarray(out), np.asarray(ref),
                               rtol=1e-5, atol=1e-5)
    print("KERNEL_OK")
</pallas_src>

<mosaic_0001>
module attributes {stable_mosaic.version = 11 : i64} {
  func.func @ae_kernel(%arg0: i32, %arg1: memref<4x128xf32, #tpu.memory_space<vmem>>, %arg2: memref<128x64xf32, #tpu.memory_space<vmem>>, %arg3: memref<1x64xf32, #tpu.memory_space<vmem>>, %arg4: memref<64x128xf32, #tpu.memory_space<vmem>>, %arg5: memref<1x128xf32, #tpu.memory_space<vmem>>, %arg6: memref<4x128xf32, #tpu.memory_space<vmem>>) attributes {dimension_semantics = [#tpu.dimension_semantics<parallel>], iteration_bounds = array<i64: 1>, scalar_prefetch = 0 : i64, scratch_operands = 0 : i64, tpu.core_type = #tpu.core_type<tc>, window_params = [{transform_indices = @transform_0, window_bounds = array<i64: 4, 128>}, {pipeline_mode = #tpu.pipeline_mode<synchronous>, transform_indices = @transform_1, window_bounds = array<i64: 128, 64>}, {pipeline_mode = #tpu.pipeline_mode<synchronous>, transform_indices = @transform_2, window_bounds = array<i64: 1, 64>}, {pipeline_mode = #tpu.pipeline_mode<synchronous>, transform_indices = @transform_3, window_bounds = array<i64: 64, 128>}, {pipeline_mode = #tpu.pipeline_mode<synchronous>, transform_indices = @transform_4, window_bounds = array<i64: 1, 128>}, {transform_indices = @transform_5, window_bounds = array<i64: 4, 128>}]} {
    %c0 = arith.constant 0 : index
    %c0_0 = arith.constant 0 : index
    %0 = vector.load %arg1[%c0, %c0_0] : memref<4x128xf32, #tpu.memory_space<vmem>>, vector<4x128xf32>
    %c0_1 = arith.constant 0 : index
    %c0_2 = arith.constant 0 : index
    %1 = vector.load %arg2[%c0_1, %c0_2] : memref<128x64xf32, #tpu.memory_space<vmem>>, vector<128x64xf32>
    %cst = arith.constant dense<0.000000e+00> : vector<4x64xf32>
    %2 = tpu.matmul %0, %1, %cst {dimension_numbers = #tpu.dot_dimension_numbers<[1], [0], [0], [1], [0, 0, 1, 1], [], []>} : vector<4x128xf32>, vector<128x64xf32>, vector<4x64xf32> -> vector<4x64xf32>
    %c0_3 = arith.constant 0 : index
    %c0_4 = arith.constant 0 : index
    %3 = vector.load %arg3[%c0_3, %c0_4] : memref<1x64xf32, #tpu.memory_space<vmem>>, vector<1x64xf32>
    %4 = vector.broadcast %3 : vector<1x64xf32> to vector<4x64xf32>
    %5 = arith.addf %2, %4 : vector<4x64xf32>
    %6 = arith.negf %5 : vector<4x64xf32>
    %7 = math.exp %6 : vector<4x64xf32>
    %cst_5 = arith.constant 1.000000e+00 : f32
    %8 = vector.broadcast %cst_5 : f32 to vector<4x64xf32>
    %9 = arith.addf %8, %7 : vector<4x64xf32>
    %10 = arith.divf %8, %9 : vector<4x64xf32>
    %c0_6 = arith.constant 0 : index
    %c0_7 = arith.constant 0 : index
    %11 = vector.load %arg4[%c0_6, %c0_7] : memref<64x128xf32, #tpu.memory_space<vmem>>, vector<64x128xf32>
    %cst_8 = arith.constant dense<0.000000e+00> : vector<4x128xf32>
    %12 = tpu.matmul %10, %11, %cst_8 {dimension_numbers = #tpu.dot_dimension_numbers<[1], [0], [0], [1], [0, 0, 1, 1], [], []>} : vector<4x64xf32>, vector<64x128xf32>, vector<4x128xf32> -> vector<4x128xf32>
    %c0_9 = arith.constant 0 : index
    %c0_10 = arith.constant 0 : index
    %13 = vector.load %arg5[%c0_9, %c0_10] : memref<1x128xf32, #tpu.memory_space<vmem>>, vector<1x128xf32>
    %14 = vector.broadcast %13 : vector<1x128xf32> to vector<4x128xf32>
    %15 = arith.addf %12, %14 : vector<4x128xf32>
    %16 = arith.negf %15 : vector<4x128xf32>
    %17 = math.exp %16 : vector<4x128xf32>
    %cst_11 = arith.constant 1.000000e+00 : f32
    %18 = vector.broadcast %cst_11 : f32 to vector<4x128xf32>
    %19 = arith.addf %18, %17 : vector<4x128xf32>
    %20 = arith.divf %18, %19 : vector<4x128xf32>
    %c0_12 = arith.constant 0 : index
    %c0_13 = arith.constant 0 : index
    %21 = vector.load %arg6[%c0_12, %c0_13] : memref<4x128xf32, #tpu.memory_space<vmem>>, vector<4x128xf32>
    tpu.vector_store %arg6[%c0_12, %c0_13], %20 {strides = array<i32>} : memref<4x128xf32, #tpu.memory_space<vmem>>, vector<4x128xf32>,
    return
  }
  func.func @transform_0(%arg0: i32) -> (i32, i32) {
    %c0_i32 = arith.constant 0 : i32
    %c0_i32_0 = arith.constant 0 : i32
    return %arg0, %c0_i32 : i32, i32
  }
  func.func @transform_1(%arg0: i32) -> (i32, i32) {
    %c0_i32 = arith.constant 0 : i32
    %c0_i32_0 = arith.constant 0 : i32
    %c0_i32_1 = arith.constant 0 : i32
    return %c0_i32, %c0_i32_0 : i32, i32
  }
  func.func @transform_2(%arg0: i32) -> (i32, i32) {
    %c0_i32 = arith.constant 0 : i32
    %c0_i32_0 = arith.constant 0 : i32
    %c0_i32_1 = arith.constant 0 : i32
    return %c0_i32, %c0_i32_0 : i32, i32
  }
  func.func @transform_3(%arg0: i32) -> (i32, i32) {
    %c0_i32 = arith.constant 0 : i32
    %c0_i32_0 = arith.constant 0 : i32
    %c0_i32_1 = arith.constant 0 : i32
    return %c0_i32, %c0_i32_0 : i32, i32
  }
  func.func @transform_4(%arg0: i32) -> (i32, i32) {
    %c0_i32 = arith.constant 0 : i32
    %c0_i32_0 = arith.constant 0 : i32
    %c0_i32_1 = arith.constant 0 : i32
    return %c0_i32, %c0_i32_0 : i32, i32
  }
  func.func @transform_5(%arg0: i32) -> (i32, i32) {
    %c0_i32 = arith.constant 0 : i32
    %c0_i32_0 = arith.constant 0 : i32
    return %arg0, %c0_i32 : i32, i32
  }
}

</mosaic_0001>

<bundles_post_ra>
// kernel: tpu_custom_call.1
= control target key start
LH: loop header
LB: loop body
LE: loop exit
PB: predicated region body
PF: predicated region fallthrough
CT: control target
= control target key end

     0   :  { %s308_s0 = inlined_call_operand.vmem [shape: f32[4,128], index: 0, kind: input, shape index: {}]   ;;  %s309_s1 = inlined_call_operand.vmem [shape: f32[128,64], index: 1, kind: input, shape index: {}]   ;;  %s310_s2 = inlined_call_operand.vmem [shape: f32[1,64], index: 2, kind: input, shape index: {}]   ;;  %s311_s3 = inlined_call_operand.vmem [shape: f32[64,128], index: 3, kind: input, shape index: {}]   ;;  %s312_s4 = inlined_call_operand.vmem [shape: f32[1,128], index: 4, kind: input, shape index: {}]   ;;  %s313_s5 = inlined_call_operand.hbm [shape: f32[4,128], index: 5, kind: output, shape index: {}]  }
   0x1   :  { %v37_v0 = vld [vmem:[%s309_s1 + $0x78] sm:$0xff]  ;;  %v36_v1 = vld [vmem:[%s309_s1 + $0x70] sm:$0xff]  ;;  %v35_v2 = vld [vmem:[%s309_s1 + $0x68] sm:$0xff] }
   0x2   :  { %42 = vmatpush.msra.mxu0 %v37_v0  ;;  %v34_v3 = vld [vmem:[%s309_s1 + $0x60] sm:$0xff]  ;;  %v33_v4 = vld [vmem:[%s309_s1 + $0x58] sm:$0xff] }
   0x4   :  { %43 = vmatpush.msra.mxu0 %v36_v1 }
   0x6   :  { %44 = vmatpush.msra.mxu0 %v35_v2 }
   0x7   :  { %10 = vsyncpa [#allocation3], 0  ;;  %v32_v5 = vld [vmem:[%s309_s1 + $0x50] sm:$0xff]  ;;  %v31_v6 = vld [vmem:[%s309_s1 + $0x48] sm:$0xff]  ;;  %vm93_vm3 = vcmask 523264   ;;  %s193_s18 = smov [#allocation2]  }
   0x8   :  { %45 = vmatpush.msra.mxu0 %v34_v3  ;;  %v30_v7 = vld [vmem:[%s309_s1 + $0x40] sm:$0xff]  ;;  %v29_v8 = vld [vmem:[%s309_s1 + $0x38] sm:$0xff]  ;;  %v28_v9 = vld [vmem:[%s309_s1 + $0x30] sm:$0xff]  ;;  %s142_s19 = sshll.u32 %s193_s18, 4  ;;  %s143_s19 = int_to_ptr.vmem [resolvable:$true] %s142_s19 }
   0x9   :  { %v27_v10 = vld [vmem:[%s309_s1 + $0x28] sm:$0xff]  ;;  %v26_v11 = vld [vmem:[%s309_s1 + $0x20] sm:$0xff]  ;;  %v25_v12 = vld [vmem:[%s309_s1 + $0x18] sm:$0xff] }
   0xa   :  { %46 = vmatpush.msra.mxu0 %v33_v4  ;;  %v24_v13 = vld [vmem:[%s309_s1 + $0x10] sm:$0xff]  ;;  %v23_v14 = vld [vmem:[%s309_s1 + $0x8] sm:$0xff]  ;;  %v22_v15 = vld [vmem:[%s309_s1] sm:$0xff] }
   0xb   :  { %v21_v16 = vld [vmem:[%s308_s0] sm:$0xf]  ;;  %v88_v17 = vld [vmem:[%s311_s3 + $0x38] sm:$0xff]  ;;  %v87_v18 = vld [vmem:[%s311_s3 + $0x30] sm:$0xff] }
   0xc   :  { %47 = vmatpush.msra.mxu0 %v32_v5  ;;  %105 = vmatpush.msra.mxu1 %v88_v17  ;;  %v86_v19 = vld [vmem:[%s311_s3 + $0x28] sm:$0xff]  ;;  %v85_v20 = vld [vmem:[%s311_s3 + $0x20] sm:$0xff]  ;;  %v84_v21 = vld [vmem:[%s311_s3 + $0x18] sm:$0xff] }
   0xd   :  { %v83_v22 = vld [vmem:[%s311_s3 + $0x10] sm:$0xff]  ;;  %v82_v23 = vld [vmem:[%s311_s3 + $0x8] sm:$0xff]  ;;  %v81_v24 = vld [vmem:[%s311_s3] sm:$0xff] }
   0xe   :  { %48 = vmatpush.msra.mxu0 %v31_v6  ;;  %106 = vmatpush.msra.mxu1 %v87_v18  ;;  %v157_v25 = vld [vmem:[%s310_s2] ss:$0 sm:$0xff] }
   0xf   :  { %v158_v41 = vld [vmem:[%s312_s4] ss:$0 sm:$0xff]  ;;  %s144_s4 = sshll.u32 %s313_s5, 4  ;;  %s145_s4 = int_to_ptr.hbm [resolvable:$true] %s144_s4 }
  0x10   :  { %49 = vmatpush.msra.mxu0 %v30_v7  ;;  %107 = vmatpush.msra.mxu1 %v86_v19 }
  0x12   :  { %50 = vmatpush.msra.mxu0 %v29_v8  ;;  %108 = vmatpush.msra.mxu1 %v85_v20 }
  0x14   :  { %51 = vmatpush.msra.mxu0 %v28_v9  ;;  %109 = vmatpush.msra.mxu1 %v84_v21 }
  0x16   :  { %52 = vmatpush.msra.mxu0 %v27_v10  ;;  %110 = vmatpush.msra.mxu1 %v83_v22 }
  0x18   :  { %53 = vmatpush.msra.mxu0 %v26_v11  ;;  %111 = vmatpush.msra.mxu1 %v82_v23 }
  0x1a   :  { %54 = vmatpush.msra.mxu0 %v25_v12  ;;  %112 = vmatpush.msra.mxu1 %v81_v24 }
  0x1c   :  { %55 = vmatpush.msra.mxu0 %v24_v13 }
  0x1e   :  { %56 = vmatpush.msra.mxu0 %v23_v14 }
  0x20   :  { %57 = vmatpush.msra.mxu0 %v22_v15 }
  0x21   :  { %58 = vmatmul.f32.vlgmr.msra.gmra.mxu0 %v21_v16 }
  0x9e   :  { %v59_v26 = vpop.f32.mrf.mxu0 }
  0x9f   :  { %v60_v27 = vadd.f32 %v157_v25, %v59_v26 }
  0xa1   :  { %v153_v28 = vmul.f32 -1.442695, %v60_v27 }
  0xa3   :  { %159 = vpow2.f32 %v153_v28 }
  0xa9   :  { %v160_v29 = vpop.eup %159 }
  0xaa   :  { %v65_v30 = vadd.f32 1.0, %v160_v29 }
  0xac   :  { %161 = vrcp.f32 %v65_v30  ;;  %v77_v34 = vand.u32 2147483648, %v65_v30  ;;  %v75_v36 = vand.u32 2147483647, %v65_v30  ;;  %vm71_vm1 = vweird.f32 %v65_v30 }
  0xae   :  { %v78_v38 = vor.u32 1.1754944e-38, %v77_v34  ;;  %vm76_vm4 = vcmp.eq.f32.partialorder %v75_v36, 8.507059e+37 }
  0xb2   :  { %v162_v31 = vpop.eup %161 }
  0xb3   :  { %v67_v32 = vmul.f32 %v162_v31, %v65_v30  ;;  %vm72_vm0 = vweird.f32 %v162_v31 }
  0xb4   :  { %vm73_vm2 = vmor %vm71_vm1, %vm72_vm0 }
  0xb5   :  { %v68_v33 = vsub.f32 1.0, %v67_v32 }
  0xb7   :  { %v69_v35 = vmul.f32 %v162_v31, %v68_v33 }
  0xb9   :  { %v70_v37 = vadd.f32 %v162_v31, %v69_v35 }
  0xbb   :  { %v74_v39 = vsel %vm73_vm2, %v162_v31, %v70_v37 }
  0xbc   :  { %v79_v40 = vsel %vm76_vm4, %v78_v38, %v74_v39 }
  0xbd   :  { %154 = vmatmul.msk.f32.vlgmr.msra.gmra.mxu1 %vm93_vm3, %v79_v40 }
 0x13a   :  { %v114_v42 = vpop.f32.mrf.mxu1 }
 0x13b   :  { %v115_v43 = vadd.f32 %v158_v41, %v114_v42 }
 0x13d   :  { %v155_v44 = vmul.f32 -1.442695, %v115_v43 }
 0x13f   :  { %163 = vpow2.f32 %v155_v44 }
 0x145   :  { %v164_v45 = vpop.eup %163 }
 0x146   :  { %v120_v46 = vadd.f32 1.0, %v164_v45 }
 0x148   :  { %165 = vrcp.f32 %v120_v46  ;;  %v132_v50 = vand.u32 2147483648, %v120_v46  ;;  %v130_v52 = vand.u32 2147483647, %v120_v46  ;;  %vm126_vm6 = vweird.f32 %v120_v46 }
 0x14a   :  { %v133_v54 = vor.u32 1.1754944e-38, %v132_v50  ;;  %vm131_vm8 = vcmp.eq.f32.partialorder %v130_v52, 8.507059e+37 }
 0x14e   :  { %v166_v47 = vpop.eup %165 }
 0x14f   :  { %v122_v48 = vmul.f32 %v166_v47, %v120_v46  ;;  %vm127_vm5 = vweird.f32 %v166_v47 }
 0x150   :  { %vm128_vm7 = vmor %vm126_vm6, %vm127_vm5 }
 0x151   :  { %v123_v49 = vsub.f32 1.0, %v122_v48 }
 0x153   :  { %v124_v51 = vmul.f32 %v166_v47, %v123_v49 }
 0x155   :  { %v125_v53 = vadd.f32 %v166_v47, %v124_v51 }
 0x157   :  { %v129_v55 = vsel %vm128_vm7, %v166_v47, %v125_v53 }
 0x158   :  { %v134_v56 = vsel %vm131_vm8, %v133_v54, %v129_v55 }
 0x159   :  { %136 = vst [vmem:[#allocation2] sm:$0xf] %v134_v56 }
 0x15a   :  { %147 = dma.vmem_to_hbm [thread:$0]  %s143_s19, 64, %s145_s4, [#allocation3]  }
 0x15b   :  { %191 = dma.done.wait [#allocation3], 64  }
 0x15c   :  { %192 = vsyncadd [#allocation3], 4294967232 }
 0x15d   :  { %152 = vsyncpa [#allocation3], 1 }

</bundles_post_ra>
